<compile_context>
chip_gen: v7x
topology: tpu7x:2x2x1
jax: 0.10.0
libtpu: 0.0.40
codegen_flags: <defaults>
</compile_context>

<pallas_src>
import jax
import jax.numpy as jnp
from jax.experimental import pallas as pl
from jax.experimental.pallas import tpu as pltpu

# ---- "global" config implied by the original script -----------------------
N = 64                      # number of samples
N_CLUSTER = 4               # n_cluster
N_VIEW = 3                  # n_view
R = 2.0                     # args.r
D = N_CLUSTER * N_VIEW      # GCN nfeat / l2 in-features / l1 out-features = 12
H = 2 * D                   # GCN nhid / l1 in-features = 24
LANES = 128

_SELU_ALPHA = 1.6732632423543772848170429916717
_SELU_SCALE = 1.0507009873554804934193349852946

# ---- activation slab layout (ACT_ROWS x 128 f32, per sample) ---------------
OFF_LM = 0            # rows  0:64   cols 0:12   LM1 natural flatten
OFF_F1 = 64           # rows 64:128  cols 0:12   F_1 (view-major flatten of W)
ACT_ROWS = 128

# ---- parameter slab layout (P_ROWS x 128 f32, shared across the batch) -----
# every sub-block starts on an 8-aligned sublane row
OFF_GC_W = 0          # rows  0:12   cols 0:24   gc weight  (D, H)
OFF_GC_B = 16         # row  16      cols 0:24   gc bias
OFF_L1_W = 24         # rows 24:48   cols 0:12   l1 weight  (H, D)  (torch W.T)
OFF_L1_B = 48         # row  48      cols 0:12   l1 bias
OFF_L2_W = 56         # rows 56:68   cols 0:4    l2 weight  (D, C)  (torch W.T)
OFF_L2_B = 72         # row  72      cols 0:4    l2 bias
OFF_SCALE = 80        # row  80      cols 0:12   per-feature view-weight scale
P_ROWS = 88

# ---- output slab layout (OUT_ROWS x 128 f32, per sample) -------------------
OUT_S_ROW = 0         # rows  0:64   cols 0:64   S_fusion
OUT_FR_ROW = 64       # rows 64:128  cols 0:4    F_r
OUT_ROWS = 128

_FLOPS_PER_SAMPLE = (2 * N * N * D          # S = rf @ rf.T
                     + 2 * N * D * H        # support = F_1 @ Wg
                     + 2 * N * N * H        # S @ support
                     + 2 * N * H * D        # l1
                     + 2 * N * D * N_CLUSTER)  # l2
_TRANSC_PER_SAMPLE = N * D + N * N_CLUSTER + N  # selu exp + softmax exp + rcp


def _grgnn_kernel(act_ref, p_ref, out_ref):
    """Per-sample forward: S = rf@rf.T ; F_gcn = relu(S@(F1@Wg)+bg) ;
    h = selu(F_gcn@W1+b1) ; F_r = softmax(h@W2+b2, axis=1)."""
    # Deterministic output slab (unused lanes become zeros, one cheap store).
    out_ref[...] = jnp.zeros(out_ref.shape, out_ref.dtype)

    # r_fusion (feature permutation vs. torch is irrelevant: S sums over
    # features, hence it is permutation-invariant).
    lm = act_ref[OFF_LM:OFF_LM + N, 0:D]                           # (N, D)
    f1 = act_ref[OFF_F1:OFF_F1 + N, 0:D]                           # (N, D)
    scale = p_ref[OFF_SCALE:OFF_SCALE + 1, 0:D]                    # (1, D)
    rf = lm * scale                                                # (N, D)

    # S_fusion = r_fusion @ r_fusion.T  (contract over feature axis)
    S = jax.lax.dot_general(rf, rf, (((1,), (1,)), ((), ())),
                            preferred_element_type=jnp.float32)    # (N, N)
    out_ref[OUT_S_ROW:OUT_S_ROW + N, 0:N] = S

    # GCN layer (Kipf GraphConvolution): adj @ (x @ W) + b, then ReLU
    gc_w = p_ref[OFF_GC_W:OFF_GC_W + D, 0:H]                       # (D, H)
    gc_b = p_ref[OFF_GC_B:OFF_GC_B + 1, 0:H]                       # (1, H)
    support = jnp.dot(f1, gc_w, preferred_element_type=jnp.float32)
    f_gcn = jnp.maximum(
        jnp.dot(S, support, preferred_element_type=jnp.float32) + gc_b, 0.0)

    # l1 + SELU (exp(min(h,0)) keeps inf out of flight)
    l1_w = p_ref[OFF_L1_W:OFF_L1_W + H, 0:D]                       # (H, D)
    l1_b = p_ref[OFF_L1_B:OFF_L1_B + 1, 0:D]                       # (1, D)
    h = jnp.dot(f_gcn, l1_w, preferred_element_type=jnp.float32) + l1_b
    h_neg = _SELU_ALPHA * (jnp.exp(jnp.minimum(h, 0.0)) - 1.0)
    h = _SELU_SCALE * jnp.where(h > 0.0, h, h_neg)                 # (N, D)

    # l2 + softmax(dim=1); the divide goes to the EUP reciprocal slot.
    l2_w = p_ref[OFF_L2_W:OFF_L2_W + D, 0:N_CLUSTER]               # (D, C)
    l2_b = p_ref[OFF_L2_B:OFF_L2_B + 1, 0:N_CLUSTER]               # (1, C)
    logits = jnp.dot(h, l2_w, preferred_element_type=jnp.float32) + l2_b
    m = jnp.max(logits, axis=1, keepdims=True)
    e = jnp.exp(logits - m)
    denom = jnp.sum(e, axis=1, keepdims=True)
    out_ref[OUT_FR_ROW:OUT_FR_ROW + N, 0:N_CLUSTER] = (
        e * pl.reciprocal(denom, approx=True))


def _pack_params(params):
    """softmax(view_weight)**r and all layer weights/biases -> one f32 slab."""
    view_w = jax.nn.softmax(params["view_weight"]) ** R            # (n_view,)
    # natural flatten of (N, n_cluster, n_view) puts feature j = c*n_view + i,
    # whose scale is view_w[i]  ->  tile the 3-vector n_cluster times.
    feat_scale = jnp.tile(view_w, (N_CLUSTER,)).astype(jnp.float32)  # (D,)

    p = jnp.zeros((P_ROWS, LANES), jnp.float32)
    p = p.at[OFF_GC_W:OFF_GC_W + D, 0:H].set(params["gc_w"])
    p = p.at[OFF_GC_B, 0:H].set(params["gc_b"])
    p = p.at[OFF_L1_W:OFF_L1_W + H, 0:D].set(params["l1_w"].T)     # (H, D)
    p = p.at[OFF_L1_B, 0:D].set(params["l1_b"])
    p = p.at[OFF_L2_W:OFF_L2_W + D, 0:N_CLUSTER].set(params["l2_w"].T)  # (D, C)
    p = p.at[OFF_L2_B, 0:N_CLUSTER].set(params["l2_b"])
    p = p.at[OFF_SCALE, 0:D].set(feat_scale)
    return p


@jax.jit
def grgnn_forward_batched(W, LM1, params):
    """B independent GRGNN.forward(W[b], LM1[b]) over a 'parallel' grid axis."""
    B = W.shape[0]
    lm_flat = LM1.reshape(B, N, D).astype(jnp.float32)             # (B, N, D)
    # F_1 is a returned output in torch's cat/squeeze layout, so the permute is
    # produced here (fused under jit) and reused as the GCN input.
    F_1 = jnp.transpose(W, (0, 1, 3, 2)).reshape(B, N, D).astype(jnp.float32)

    act = jnp.zeros((B, ACT_ROWS, LANES), jnp.float32)
    act = act.at[:, OFF_LM:OFF_LM + N, 0:D].set(lm_flat)
    act = act.at[:, OFF_F1:OFF_F1 + N, 0:D].set(F_1)
    packed = _pack_params(params)

    cost = pl.CostEstimate(
        flops=B * _FLOPS_PER_SAMPLE,
        transcendentals=B * _TRANSC_PER_SAMPLE,
        bytes_accessed=B * (ACT_ROWS + OUT_ROWS) * LANES * 4 + P_ROWS * LANES * 4)

    out = pl.pallas_call(
        _grgnn_kernel,
        grid=(B,),
        in_specs=[
            pl.BlockSpec((None, ACT_ROWS, LANES), lambda b: (b, 0, 0)),
            pl.BlockSpec((P_ROWS, LANES), lambda b: (0, 0)),   # shared, resident
        ],
        out_specs=pl.BlockSpec((None, OUT_ROWS, LANES), lambda b: (b, 0, 0)),
        out_shape=jax.ShapeDtypeStruct((B, OUT_ROWS, LANES), jnp.float32),
        compiler_params=pltpu.CompilerParams(
            dimension_semantics=("parallel",)),
        cost_estimate=cost,
    )(act, packed)

    S_fusion = out[:, OUT_S_ROW:OUT_S_ROW + N, 0:N]                # (B, N, N)
    F_r = out[:, OUT_FR_ROW:OUT_FR_ROW + N, 0:N_CLUSTER]           # (B, N, C)
    return F_r, F_1, S_fusion


@jax.jit
def grgnn_forward(W, LM1, params):
    """Mirrors GRGNN.forward(W, LM1) -> (F_r, F_1, S_fusion) for one sample."""
    F_r, F_1, S = grgnn_forward_batched(W[None], LM1[None], params)
    return F_r[0], F_1[0], S[0]


def init_params(key):
    """Deterministic parameter init matching the module's __init__ shapes."""
    ks = jax.random.split(key, 6)
    scale = 0.1
    return {
        # nn.Parameter(torch.full((n_view,), 1.0))
        "view_weight": jnp.ones((N_VIEW,), jnp.float32),
        # GraphConvolution(D, H): weight (in, out), bias (out,)
        "gc_w": scale * jax.random.normal(ks[0], (D, H), jnp.float32),
        "gc_b": scale * jax.random.normal(ks[1], (H,), jnp.float32),
        # nn.Linear(H, D): weight (out, in), bias (out,)
        "l1_w": scale * jax.random.normal(ks[2], (D, H), jnp.float32),
        "l1_b": scale * jax.random.normal(ks[3], (D,), jnp.float32),
        # nn.Linear(D, n_cluster)
        "l2_w": scale * jax.random.normal(ks[4], (N_CLUSTER, D), jnp.float32),
        "l2_b": scale * jax.random.normal(ks[5], (N_CLUSTER,), jnp.float32),
    }


def _reference(W, LM1, params):
    """Pure-JAX mirror of the torch forward (with the explicit transposes)."""
    vw = jax.nn.softmax(params["view_weight"]) ** R
    rf = jnp.transpose(LM1 * vw[None, None, :], (0, 2, 1)).reshape(N, D)
    F_1 = jnp.transpose(W, (0, 2, 1)).reshape(N, D)
    S = rf @ rf.T
    f_gcn = jax.nn.relu(S @ (F_1 @ params["gc_w"]) + params["gc_b"])
    h = jax.nn.selu(f_gcn @ params["l1_w"].T + params["l1_b"])
    F_r = jax.nn.softmax(h @ params["l2_w"].T + params["l2_b"], axis=1)
    return F_r, F_1, S


if __name__ == "__main__":
    key = jax.random.PRNGKey(0)
    k_w, k_lm, k_p, k_wb, k_lmb = jax.random.split(key, 5)

    # forward(W, LM1): both (N, n_cluster, n_view)
    W = jax.random.uniform(k_w, (N, N_CLUSTER, N_VIEW), jnp.float32)
    LM1 = jax.random.uniform(k_lm, (N, N_CLUSTER, N_VIEW), jnp.float32)
    params = init_params(k_p)

    F_r, F_1, S_fusion = grgnn_forward(W, LM1, params)
    jax.block_until_ready((F_r, F_1, S_fusion))

    assert F_r.shape == (N, N_CLUSTER)
    assert F_1.shape == (N, D)
    assert S_fusion.shape == (N, N)

    # correctness check against a pure-JAX mirror of the torch module
    F_r_ref, F_1_ref, S_ref = _reference(W, LM1, params)
    assert jnp.allclose(S_fusion, S_ref, rtol=1e-4, atol=1e-5)
    assert jnp.allclose(F_1, F_1_ref, rtol=1e-4, atol=1e-5)
    # F_r uses the approx EUP reciprocal for the softmax denominator:
    # the renormalized check is immune to the rcp approximation (tight), the
    # direct check + row-sum check bound the approximation error (loose).
    F_r_renorm = F_r / jnp.sum(F_r, axis=1, keepdims=True)
    assert jnp.allclose(F_r_renorm, F_r_ref, rtol=1e-4, atol=1e-5)
    assert jnp.allclose(F_r, F_r_ref, rtol=5e-3, atol=5e-3)
    assert jnp.allclose(jnp.sum(F_r, axis=1), 1.0, atol=1e-2)

    # batched path: 4 independent forwards through the "parallel" grid axis
    B = 4
    Wb = jax.random.uniform(k_wb, (B, N, N_CLUSTER, N_VIEW), jnp.float32)
    LMb = jax.random.uniform(k_lmb, (B, N, N_CLUSTER, N_VIEW), jnp.float32)
    F_rb, F_1b, Sb = grgnn_forward_batched(Wb, LMb, params)
    jax.block_until_ready((F_rb, F_1b, Sb))
    for b in range(B):
        fr_ref, f1_ref, s_ref = _reference(Wb[b], LMb[b], params)
        assert jnp.allclose(Sb[b], s_ref, rtol=1e-4, atol=1e-5)
        assert jnp.allclose(F_1b[b], f1_ref, rtol=1e-4, atol=1e-5)
        assert jnp.allclose(F_rb[b], fr_ref, rtol=5e-3, atol=5e-3)

    print("KERNEL_OK")
</pallas_src>

<mosaic_0001>
module attributes {stable_mosaic.version = 11 : i64} {
  func.func @_grgnn_kernel(%arg0: i32, %arg1: memref<1x128x128xf32, #tpu.memory_space<vmem>>, %arg2: memref<88x128xf32, #tpu.memory_space<vmem>>, %arg3: memref<1x128x128xf32, #tpu.memory_space<vmem>>) attributes {dimension_semantics = [#tpu.dimension_semantics<parallel>], iteration_bounds = array<i64: 1>, scalar_prefetch = 0 : i64, scratch_operands = 0 : i64, tpu.core_type = #tpu.core_type<tc>, window_params = [{transform_indices = @transform_0, window_bounds = array<i64: 1, 128, 128>}, {pipeline_mode = #tpu.pipeline_mode<synchronous>, transform_indices = @transform_1, window_bounds = array<i64: 88, 128>}, {transform_indices = @transform_2, window_bounds = array<i64: 1, 128, 128>}]} {
    %cst = arith.constant 0.000000e+00 : f32
    %0 = vector.broadcast %cst : f32 to vector<128x128xf32>
    %c0 = arith.constant 0 : index
    %c0_0 = arith.constant 0 : index
    %c0_1 = arith.constant 0 : index
    %1 = vector.load %arg3[%c0, %c0_0, %c0_1] : memref<1x128x128xf32, #tpu.memory_space<vmem>>, vector<1x128x128xf32>
    %2 = vector.shape_cast %1 : vector<1x128x128xf32> to vector<128x128xf32>
    %3 = vector.shape_cast %0 : vector<128x128xf32> to vector<1x128x128xf32>
    tpu.vector_store %arg3[%c0, %c0_0, %c0_1], %3 {strides = array<i32>} : memref<1x128x128xf32, #tpu.memory_space<vmem>>, vector<1x128x128xf32>,
    %c0_2 = arith.constant 0 : index
    %c0_3 = arith.constant 0 : index
    %c0_4 = arith.constant 0 : index
    %4 = vector.load %arg1[%c0_2, %c0_3, %c0_4] : memref<1x128x128xf32, #tpu.memory_space<vmem>>, vector<1x64x12xf32>
    %5 = vector.shape_cast %4 : vector<1x64x12xf32> to vector<64x12xf32>
    %c0_5 = arith.constant 0 : index
    %c64 = arith.constant 64 : index
    %c0_6 = arith.constant 0 : index
    %6 = vector.load %arg1[%c0_5, %c64, %c0_6] : memref<1x128x128xf32, #tpu.memory_space<vmem>>, vector<1x64x12xf32>
    %7 = vector.shape_cast %6 : vector<1x64x12xf32> to vector<64x12xf32>
    %c80 = arith.constant 80 : index
    %c0_7 = arith.constant 0 : index
    %8 = vector.load %arg2[%c80, %c0_7] : memref<88x128xf32, #tpu.memory_space<vmem>>, vector<1x12xf32>
    %9 = vector.broadcast %8 : vector<1x12xf32> to vector<64x12xf32>
    %10 = arith.mulf %5, %9 : vector<64x12xf32>
    %cst_8 = arith.constant dense<0.000000e+00> : vector<64x64xf32>
    %11 = tpu.matmul %10, %10, %cst_8 {dimension_numbers = #tpu.dot_dimension_numbers<[1], [1], [0], [0], [0, 0, 1, 0], [], []>} : vector<64x12xf32>, vector<64x12xf32>, vector<64x64xf32> -> vector<64x64xf32>
    %c0_9 = arith.constant 0 : index
    %c0_10 = arith.constant 0 : index
    %c0_11 = arith.constant 0 : index
    %12 = vector.load %arg3[%c0_9, %c0_10, %c0_11] : memref<1x128x128xf32, #tpu.memory_space<vmem>>, vector<1x64x64xf32>
    %13 = vector.shape_cast %12 : vector<1x64x64xf32> to vector<64x64xf32>
    %14 = vector.shape_cast %11 : vector<64x64xf32> to vector<1x64x64xf32>
    tpu.vector_store %arg3[%c0_9, %c0_10, %c0_11], %14 {strides = array<i32>} : memref<1x128x128xf32, #tpu.memory_space<vmem>>, vector<1x64x64xf32>,
    %c0_12 = arith.constant 0 : index
    %c0_13 = arith.constant 0 : index
    %15 = vector.load %arg2[%c0_12, %c0_13] : memref<88x128xf32, #tpu.memory_space<vmem>>, vector<12x24xf32>
    %c16 = arith.constant 16 : index
    %c0_14 = arith.constant 0 : index
    %16 = vector.load %arg2[%c16, %c0_14] : memref<88x128xf32, #tpu.memory_space<vmem>>, vector<1x24xf32>
    %cst_15 = arith.constant dense<0.000000e+00> : vector<64x24xf32>
    %17 = tpu.matmul %7, %15, %cst_15 {dimension_numbers = #tpu.dot_dimension_numbers<[1], [0], [0], [1], [0, 0, 1, 1], [], []>} : vector<64x12xf32>, vector<12x24xf32>, vector<64x24xf32> -> vector<64x24xf32>
    %cst_16 = arith.constant dense<0.000000e+00> : vector<64x24xf32>
    %18 = tpu.matmul %11, %17, %cst_16 {dimension_numbers = #tpu.dot_dimension_numbers<[1], [0], [0], [1], [0, 0, 1, 1], [], []>} : vector<64x64xf32>, vector<64x24xf32>, vector<64x24xf32> -> vector<64x24xf32>
    %19 = vector.broadcast %16 : vector<1x24xf32> to vector<64x24xf32>
    %20 = arith.addf %18, %19 : vector<64x24xf32>
    %cst_17 = arith.constant 0.000000e+00 : f32
    %21 = vector.broadcast %cst_17 : f32 to vector<64x24xf32>
    %22 = arith.maximumf %20, %21 : vector<64x24xf32>
    %c24 = arith.constant 24 : index
    %c0_18 = arith.constant 0 : index
    %23 = vector.load %arg2[%c24, %c0_18] : memref<88x128xf32, #tpu.memory_space<vmem>>, vector<24x12xf32>
    %c48 = arith.constant 48 : index
    %c0_19 = arith.constant 0 : index
    %24 = vector.load %arg2[%c48, %c0_19] : memref<88x128xf32, #tpu.memory_space<vmem>>, vector<1x12xf32>
    %cst_20 = arith.constant dense<0.000000e+00> : vector<64x12xf32>
    %25 = tpu.matmul %22, %23, %cst_20 {dimension_numbers = #tpu.dot_dimension_numbers<[1], [0], [0], [1], [0, 0, 1, 1], [], []>} : vector<64x24xf32>, vector<24x12xf32>, vector<64x12xf32> -> vector<64x12xf32>
    %26 = vector.broadcast %24 : vector<1x12xf32> to vector<64x12xf32>
    %27 = arith.addf %25, %26 : vector<64x12xf32>
    %cst_21 = arith.constant 0.000000e+00 : f32
    %28 = vector.broadcast %cst_21 : f32 to vector<64x12xf32>
    %29 = arith.minimumf %27, %28 : vector<64x12xf32>
    %30 = math.exp %29 : vector<64x12xf32>
    %cst_22 = arith.constant 1.000000e+00 : f32
    %31 = vector.broadcast %cst_22 : f32 to vector<64x12xf32>
    %32 = arith.subf %30, %31 : vector<64x12xf32>
    %cst_23 = arith.constant 1.67326319 : f32
    %33 = vector.broadcast %cst_23 : f32 to vector<64x12xf32>
    %34 = arith.mulf %33, %32 : vector<64x12xf32>
    %cst_24 = arith.constant 0.000000e+00 : f32
    %35 = vector.broadcast %cst_24 : f32 to vector<64x12xf32>
    %36 = arith.cmpf ogt, %27, %35 : vector<64x12xf32>
    %37 = arith.select %36, %27, %34 : vector<64x12xi1>, vector<64x12xf32>
    %cst_25 = arith.constant 1.05070102 : f32
    %38 = vector.broadcast %cst_25 : f32 to vector<64x12xf32>
    %39 = arith.mulf %38, %37 : vector<64x12xf32>
    %c56 = arith.constant 56 : index
    %c0_26 = arith.constant 0 : index
    %40 = vector.load %arg2[%c56, %c0_26] : memref<88x128xf32, #tpu.memory_space<vmem>>, vector<12x4xf32>
    %c72 = arith.constant 72 : index
    %c0_27 = arith.constant 0 : index
    %41 = vector.load %arg2[%c72, %c0_27] : memref<88x128xf32, #tpu.memory_space<vmem>>, vector<1x4xf32>
    %cst_28 = arith.constant dense<0.000000e+00> : vector<64x4xf32>
    %42 = tpu.matmul %39, %40, %cst_28 {dimension_numbers = #tpu.dot_dimension_numbers<[1], [0], [0], [1], [0, 0, 1, 1], [], []>} : vector<64x12xf32>, vector<12x4xf32>, vector<64x4xf32> -> vector<64x4xf32>
    %43 = vector.broadcast %41 : vector<1x4xf32> to vector<64x4xf32>
    %44 = arith.addf %42, %43 : vector<64x4xf32>
    %cst_29 = arith.constant dense<0xFF800000> : vector<64xf32>
    %45 = vector.multi_reduction <maximumf>, %44, %cst_29 [1] : vector<64x4xf32> to vector<64xf32>
    %46 = vector.shape_cast %45 : vector<64xf32> to vector<64x1xf32>
    %47 = vector.broadcast %46 : vector<64x1xf32> to vector<64x4xf32>
    %48 = arith.subf %44, %47 : vector<64x4xf32>
    %49 = math.exp %48 : vector<64x4xf32>
    %cst_30 = arith.constant dense<0.000000e+00> : vector<64xf32>
    %50 = vector.multi_reduction <add>, %49, %cst_30 [1] : vector<64x4xf32> to vector<64xf32>
    %51 = vector.shape_cast %50 : vector<64xf32> to vector<64x1xf32>
    %52 = tpu.reciprocal %51 {approx = true} : vector<64x1xf32> -> vector<64x1xf32>
    %53 = vector.broadcast %52 : vector<64x1xf32> to vector<64x4xf32>
    %54 = arith.mulf %49, %53 : vector<64x4xf32>
    %c0_31 = arith.constant 0 : index
    %c64_32 = arith.constant 64 : index
    %c0_33 = arith.constant 0 : index
    %55 = vector.load %arg3[%c0_31, %c64_32, %c0_33] : memref<1x128x128xf32, #tpu.memory_space<vmem>>, vector<1x64x4xf32>
    %56 = vector.shape_cast %55 : vector<1x64x4xf32> to vector<64x4xf32>
    %57 = vector.shape_cast %54 : vector<64x4xf32> to vector<1x64x4xf32>
    tpu.vector_store %arg3[%c0_31, %c64_32, %c0_33], %57 {strides = array<i32>} : memref<1x128x128xf32, #tpu.memory_space<vmem>>, vector<1x64x4xf32>,
    return
  }
  func.func @transform_0(%arg0: i32) -> (i32, i32, i32) {
    %c0_i32 = arith.constant 0 : i32
    %c0_i32_0 = arith.constant 0 : i32
    %c0_i32_1 = arith.constant 0 : i32
    return %arg0, %c0_i32, %c0_i32_0 : i32, i32, i32
  }
  func.func @transform_1(%arg0: i32) -> (i32, i32) {
    %c0_i32 = arith.constant 0 : i32
    %c0_i32_0 = arith.constant 0 : i32
    %c0_i32_1 = arith.constant 0 : i32
    return %c0_i32, %c0_i32_0 : i32, i32
  }
  func.func @transform_2(%arg0: i32) -> (i32, i32, i32) {
    %c0_i32 = arith.constant 0 : i32
    %c0_i32_0 = arith.constant 0 : i32
    %c0_i32_1 = arith.constant 0 : i32
    return %arg0, %c0_i32, %c0_i32_0 : i32, i32, i32
  }
}

</mosaic_0001>

<bundles_post_ra>
// kernel: tile.8
= control target key start
LH: loop header
LB: loop body
LE: loop exit
PB: predicated region body
PF: predicated region fallthrough
CT: control target
= control target key end

     0   :  { %s22_s0 = inlined_call_operand.vmem [shape: f32[3], index: 0, kind: input, shape index: {}]   ;;  %s23_s1 = inlined_call_operand.vmem [shape: f32[4,3], index: 1, kind: output, shape index: {}]  }
   0x1   :  { %v4_v0 = vld [vmem:[%s22_s0] ss:$0 sm:$0xff] }
   0x2   :  { %5 = vst [vmem:[%s23_s1] sm:$0xf] %v4_v0 }

// kernel: grgnn_forward_batched.1
= control target key start
LH: loop header
LB: loop body
LE: loop exit
PB: predicated region body
PF: predicated region fallthrough
CT: control target
= control target key end

     0   :  { %vm56_vm0 = vcmask 97280   ;;  %vm222_vm1 = vcmask 1043456   ;;  %vm1253_vm3 = vmmov 1   ;;  %v1254_v34 = vmov 0.0   ;;  %s1557_s0 = inlined_call_operand.vmem [shape: f32[1,128,128], index: 0, kind: input, shape index: {}]   ;;  %s1558_s1 = inlined_call_operand.vmem [shape: f32[88,128], index: 1, kind: input, shape index: {}]   ;;  %s1559_s2 = inlined_call_operand.vmem [shape: f32[1,128,128], index: 2, kind: output, shape index: {}]  }
   0x1   :  { %v27_v0 = vld [vmem:[%s1557_s0] sm:$0xff]  ;;  %v28_v1 = vld [vmem:[%s1557_s0 + $0x8] sm:$0xff]  ;;  %v914_v2 = vld [vmem:[%s1558_s1 + $0x50] ss:$0 sm:$0xff]  ;;  %12 = vst [vmem:[%s1559_s2 + $0x8] sm:$0xff] %v1254_v34  ;;  %vm186_vm5 = vcmask 523264  }
   0x2   :  { %v48_v3 = vmul.f32 %v914_v2, %v27_v0  ;;  %v49_v4 = vmul.f32 %v914_v2, %v28_v1  ;;  %vm1281_vm2 = vmpackc.low %vm56_vm0, %vm56_vm0  ;;  %v29_v6 = vld [vmem:[%s1557_s0 + $0x10] sm:$0xff]  ;;  %v30_v7 = vld [vmem:[%s1557_s0 + $0x18] sm:$0xff]  ;;  %11 = vst [vmem:[%s1559_s2] sm:$0xff] %v1254_v34  ;;  %vm480_vm6 = vcmask 195584   ;;  %vm813_vm15 = vcmask 31744  }
   0x3   :  { %v50_v8 = vmul.f32 %v914_v2, %v29_v6  ;;  %v51_v9 = vmul.f32 %v914_v2, %v30_v7  ;;  %v195_v10 = vld [vmem:[%s1558_s1] sm:$0xff]  ;;  %v196_v11 = vld [vmem:[%s1558_s1 + $0x8] sm:$0xf]  ;;  %vm1297_vm4 = vmpackc.low %vm222_vm1, %vm1253_vm3  ;;  %13 = vst [vmem:[%s1559_s2 + $0x10] sm:$0xff] %v1254_v34 }
   0x4   :  { %v1145_v13 = vpack.c.bf16 %v49_v4, %v48_v3  ;;  %v1169_v14 = vpack.c.bf16 %v196_v11, %v195_v10  ;;  %v35_v15 = vld [vmem:[%s1557_s0 + $0x40] sm:$0xff]  ;;  %1055 = vmatprep.mubr.msk.f32.mxu0 %vm56_vm0, %v48_v3  ;;  %v32_v18 = vld [vmem:[%s1557_s0 + $0x28] sm:$0xff]  ;;  %v37_v20 = vld [vmem:[%s1557_s0 + $0x50] sm:$0xff]  ;;  %14 = vst [vmem:[%s1559_s2 + $0x18] sm:$0xff] %v1254_v34 }
   0x5   :  { %v1151_v16 = vpack.c.bf16 %v51_v9, %v50_v8  ;;  %1071 = vmatprep.mubr.msk.f32.mxu1 %vm56_vm0, %v35_v15  ;;  %v31_v17 = vld [vmem:[%s1557_s0 + $0x20] sm:$0xff]  ;;  %v36_v19 = vld [vmem:[%s1557_s0 + $0x48] sm:$0xff]  ;;  %v53_v22 = vmul.f32 %v914_v2, %v32_v18  ;;  %v38_v23 = vld [vmem:[%s1557_s0 + $0x58] sm:$0xff]  ;;  %15 = vst [vmem:[%s1559_s2 + $0x20] sm:$0xff] %v1254_v34 }
   0x6   :  { %1147 = vmatprep.subr.msk.bf16.mxu0 %vm1281_vm2, %v1145_v13  ;;  %1171 = vmatprep.subr.msk.bf16.mxu1 %vm1297_vm4, %v1169_v14  ;;  %v52_v21 = vmul.f32 %v914_v2, %v31_v17  ;;  %v39_v25 = vld [vmem:[%s1557_s0 + $0x60] sm:$0xff]  ;;  %v33_v26 = vld [vmem:[%s1557_s0 + $0x30] sm:$0xff]  ;;  %v34_v27 = vld [vmem:[%s1557_s0 + $0x38] sm:$0xff]  ;;  %16 = vst [vmem:[%s1559_s2 + $0x28] sm:$0xff] %v1254_v34 }
   0x7   :  { %1150 = vmatpush3.bf16.xpose.msk.msra.mxu0 %vm1281_vm2, %v1145_v13  ;;  %1174 = vmatpush3.bf16.msk.msra.mxu1 %vm1297_vm4, %v1169_v14  ;;  %v40_v28 = vld [vmem:[%s1557_s0 + $0x68] sm:$0xff]  ;;  %v41_v29 = vld [vmem:[%s1557_s0 + $0x70] sm:$0xff]  ;;  %v54_v30 = vmul.f32 %v914_v2, %v33_v26  ;;  %v55_v31 = vmul.f32 %v914_v2, %v34_v27  ;;  %v42_v32 = vld [vmem:[%s1557_s0 + $0x78] sm:$0xff]  ;;  %17 = vst [vmem:[%s1559_s2 + $0x30] sm:$0xff] %v1254_v34 }
   0x8   :  { %1153 = vmatprep.subr.msk.bf16.mxu0 %vm1281_vm2, %v1151_v16  ;;  %v1157_v24 = vpack.c.bf16 %v53_v22, %v52_v21  ;;  %18 = vst [vmem:[%s1559_s2 + $0x38] sm:$0xff] %v1254_v34  ;;  %19 = vst [vmem:[%s1559_s2 + $0x40] sm:$0xff] %v1254_v34  ;;  %v472_v44 = vld [vmem:[%s1558_s1 + $0x18] sm:$0xff]  ;;  %v473_v45 = vld [vmem:[%s1558_s1 + $0x20] sm:$0xff] }
   0x9   :  { %v1163_v33 = vpack.c.bf16 %v55_v31, %v54_v30  ;;  %20 = vst [vmem:[%s1559_s2 + $0x48] sm:$0xff] %v1254_v34  ;;  %21 = vst [vmem:[%s1559_s2 + $0x50] sm:$0xff] %v1254_v34  ;;  %v1191_v49 = vpack.c.bf16 %v473_v45, %v472_v44  ;;  %v474_v52 = vld [vmem:[%s1558_s1 + $0x28] sm:$0xff]  ;;  %v940_v59 = vld [vmem:[%s1558_s1 + $0x10] ss:$0 sm:$0xff] }
   0xa   :  { %1072 = vmatmul.mubr.msk.f32.vlgmr.msra.gmra.mrb[0].mxu1 %vm56_vm0, %v36_v19  ;;  %22 = vst [vmem:[%s1559_s2 + $0x58] sm:$0xff] %v1254_v34  ;;  %23 = vst [vmem:[%s1559_s2 + $0x60] sm:$0xff] %v1254_v34 }
   0xb   :  { %1074 = vmatprep.mubr.msk.f32.mxu1 %vm56_vm0, %v37_v20  ;;  %24 = vst [vmem:[%s1559_s2 + $0x68] sm:$0xff] %v1254_v34  ;;  %25 = vst [vmem:[%s1559_s2 + $0x70] sm:$0xff] %v1254_v34 }
   0xc   :  { %26 = vst [vmem:[%s1559_s2 + $0x78] sm:$0xff] %v1254_v34 }
   0xe   :  { %1075 = vmatmul.mubr.msk.f32.gmra.mrb[2].mxu1 %vm56_vm0, %v38_v23 }
   0xf   :  { %1156 = vmatpush3.bf16.xpose.msk.msra.mxu0 %vm1281_vm2, %v1151_v16  ;;  %1077 = vmatprep.mubr.msk.f32.mxu1 %vm56_vm0, %v39_v25 }
  0x10   :  { %1159 = vmatprep.subr.msk.bf16.mxu0 %vm1281_vm2, %v1157_v24 }
  0x12   :  { %1078 = vmatmul.mubr.msk.f32.gmra.mrb[4].mxu1 %vm56_vm0, %v40_v28 }
  0x13   :  { %1080 = vmatprep.mubr.msk.f32.mxu1 %vm56_vm0, %v41_v29 }
  0x16   :  { %1081 = vmatmul.mubr.msk.f32.gmra.mrb[6].mxu1 %vm56_vm0, %v42_v32 }
  0x17   :  { %1162 = vmatpush3.bf16.xpose.msk.msra.mxu0 %vm1281_vm2, %v1157_v24  ;;  %v949_v24 = vld [vmem:[%s1558_s1 + $0x30] ss:$0 sm:$0xff] }
  0x18   :  { %1165 = vmatprep.subr.msk.bf16.mxu0 %vm1281_vm2, %v1163_v33 }
  0x1f   :  { %1168 = vmatpush3.bf16.xpose.msk.msra.mxu0 %vm1281_vm2, %v1163_v33 }
  0x26   :  { %1056 = vmatmul.mubr.msk.f32.vlgmr.msra.gmra.mrb[0].mxu0 %vm56_vm0, %v49_v4 }
  0x27   :  { %1058 = vmatprep.mubr.msk.f32.mxu0 %vm56_vm0, %v50_v8 }
  0x2a   :  { %1059 = vmatmul.mubr.msk.f32.gmra.mrb[2].mxu0 %vm56_vm0, %v51_v9 }
  0x2b   :  { %1061 = vmatprep.mubr.msk.f32.mxu0 %vm56_vm0, %v52_v21  ;;  %v674_v21 = vld [vmem:[%s1558_s1 + $0x38] sm:$0xff] }
  0x2e   :  { %1062 = vmatmul.mubr.msk.f32.gmra.mrb[4].mxu0 %vm56_vm0, %v53_v22  ;;  %v675_v22 = vld [vmem:[%s1558_s1 + $0x40] sm:$0xf] }
  0x2f   :  { %1064 = vmatprep.mubr.msk.f32.mxu0 %vm56_vm0, %v54_v30  ;;  %v1195_v23 = vpack.c.bf16 %v675_v22, %v674_v21 }
  0x31   :  { %1197 = vmatprep.subr.msk.bf16.mxu0 %vm1297_vm4, %v1195_v23 }
  0x32   :  { %1065 = vmatmul.mubr.msk.f32.gmra.mrb[6].mxu0 %vm56_vm0, %v55_v31 }
  0x33   :  { %1200 = vmatpush3.bf16.msk.msra.mxu0 %vm1297_vm4, %v1195_v23 }
  0xdd   :  { %v1073_v35 = vpop.f32.mrb[0].mxu1 }
  0xde   :  { %v292_v36 = vpop.f32.mrb[1].mxu1 }
  0xdf   :  { %v1175_v37 = vpack.c.bf16 %v1073_v35, %v292_v36 }
  0xe1   :  { %v1076_v38 = vpop.f32.mrb[2].mxu1  ;;  %1176 = vmatprep.subr.bf16.mxu1 %v1175_v37 }
  0xe2   :  { %v302_v39 = vpop.f32.mrb[3].mxu1  ;;  %1178 = vmatpush3.bf16.msra.mxu1 %v1175_v37 }
  0xe3   :  { %v1179_v40 = vpack.c.bf16 %v1076_v38, %v302_v39 }
  0xe5   :  { %v1079_v41 = vpop.f32.mrb[4].mxu1  ;;  %1180 = vmatprep.subr.bf16.mxu1 %v1179_v40 }
  0xe6   :  { %v312_v42 = vpop.f32.mrb[5].mxu1  ;;  %1182 = vmatpush3.bf16.msra.mxu1 %v1179_v40 }
  0xe7   :  { %v1183_v43 = vpack.c.bf16 %v1079_v41, %v312_v42 }
  0xe9   :  { %v1082_v46 = vpop.f32.mrb[6].mxu1  ;;  %1184 = vmatprep.subr.bf16.mxu1 %v1183_v43 }
  0xea   :  { %v322_v47 = vpop.f32.mrb[7].mxu1  ;;  %1186 = vmatpush3.bf16.msra.mxu1 %v1183_v43 }
  0xeb   :  { %v1187_v48 = vpack.c.bf16 %v1082_v46, %v322_v47 }
  0xed   :  { %1188 = vmatprep.subr.bf16.mxu1 %v1187_v48 }
  0xee   :  { %1190 = vmatpush3.bf16.msra.mxu1 %v1187_v48 }
  0xef   :  { %1192 = vmatprep.subr.bf16.mxu1 %v1191_v49 }
  0xf9   :  { %v1057_v50 = vpop.f32.mrb[0].mxu0 }
  0xfa   :  { %188 = vst.msk [vmem:[%s1559_s2 + $0x8] sm:$0xff] %vm186_vm5, %v1057_v50  ;;  %v147_v51 = vpop.f32.mrb[1].mxu0 }
  0xfb   :  { %187 = vst.msk [vmem:[%s1559_s2] sm:$0xff] %vm186_vm5, %v147_v51  ;;  %1099 = vmatprep.mubr.msk.f32.mxu1 %vm186_vm5, %v147_v51 }
  0xfc   :  { %1100 = vmatmul.mubr.msk.f32.vlgmr.msra.gmra.mrb[8].mxu1 %vm186_vm5, %v1057_v50 }
  0xfd   :  { %v1060_v53 = vpop.f32.mrb[2].mxu0  ;;  %1194 = vmatpush3.bf16.msra.mxu1 %v1191_v49 }
  0xfe   :  { %190 = vst.msk [vmem:[%s1559_s2 + $0x18] sm:$0xff] %vm186_vm5, %v1060_v53  ;;  %v157_v54 = vpop.f32.mrb[3].mxu0  ;;  %1115 = vmatprep.subr.mxu1 %v474_v52 }
  0xff   :  { %189 = vst.msk [vmem:[%s1559_s2 + $0x10] sm:$0xff] %vm186_vm5, %v157_v54  ;;  %1102 = vmatprep.mubr.msk.f32.mxu1 %vm186_vm5, %v157_v54 }
 0x100   :  { %1103 = vmatmul.mubr.msk.f32.gmra.mrb[10].mxu1 %vm186_vm5, %v1060_v53 }
 0x101   :  { %v1063_v55 = vpop.f32.mrb[4].mxu0  ;;  %1116 = vmatpush3.msra.mxu1 %v474_v52 }
 0x102   :  { %192 = vst.msk [vmem:[%s1559_s2 + $0x28] sm:$0xff] %vm186_vm5, %v1063_v55  ;;  %v167_v56 = vpop.f32.mrb[5].mxu0  ;;  %1201 = vmatprep.subr.msk.bf16.mxu1 %vm1297_vm4, %v1195_v23 }
 0x103   :  { %191 = vst.msk [vmem:[%s1559_s2 + $0x20] sm:$0xff] %vm186_vm5, %v167_v56  ;;  %1105 = vmatprep.mubr.msk.f32.mxu1 %vm186_vm5, %v167_v56 }
 0x104   :  { %1106 = vmatmul.mubr.msk.f32.gmra.mrb[12].mxu1 %vm186_vm5, %v1063_v55 }
 0x105   :  { %v1066_v57 = vpop.f32.mrb[6].mxu0 }
 0x106   :  { %194 = vst.msk [vmem:[%s1559_s2 + $0x38] sm:$0xff] %vm186_vm5, %v1066_v57  ;;  %v177_v58 = vpop.f32.mrb[7].mxu0 }
 0x107   :  { %193 = vst.msk [vmem:[%s1559_s2 + $0x30] sm:$0xff] %vm186_vm5, %v177_v58  ;;  %1108 = vmatprep.mubr.msk.f32.mxu1 %vm186_vm5, %v177_v58 }
 0x108   :  { %1109 = vmatmul.mubr.msk.f32.gmra.mrb[14].mxu1 %vm186_vm5, %v1066_v57 }
 0x1cf   :  { %v1101_v60 = vpop.f32.mrb[8].mxu1 }
 0x1d0   :  { %v431_v61 = vadd.f32 %v1101_v60, %v940_v59  ;;  %v425_v62 = vpop.f32.mrb[9].mxu1 }
 0x1d1   :  { %v426_v63 = vadd.f32 %v940_v59, %v425_v62 }
 0x1d2   :  { %v465_v2 = vmax.f32 %v431_v61, 0.0 }
 0x1d3   :  { %v464_v0 = vmax.f32 %v426_v63, 0.0  ;;  %v1104_v1 = vpop.f32.mrb[10].mxu1 }
 0x1d4   :  { %v441_v3 = vadd.f32 %v1104_v1, %v940_v59  ;;  %v435_v4 = vpop.f32.mrb[11].mxu1 }
 0x1d5   :  { %v436_v5 = vadd.f32 %v940_v59, %v435_v4  ;;  %1117 = vmatprep.mubr.msk.f32.mxu1 %vm480_vm6, %v464_v0 }
 0x1d6   :  { %1118 = vmatmul.mubr.msk.f32.vlgmr.msra.gmra.mrb[16].mxu1 %vm480_vm6, %v465_v2  ;;  %v467_v8 = vmax.f32 %v441_v3, 0.0 }
 0x1d7   :  { %v466_v6 = vmax.f32 %v436_v5, 0.0  ;;  %v1107_v7 = vpop.f32.mrb[12].mxu1  ;;  %1202 = vmatpush3.bf16.msk.msra.mxu1 %vm1297_vm4, %v1195_v23 }
 0x1d8   :  { %v451_v9 = vadd.f32 %v1107_v7, %v940_v59  ;;  %v445_v10 = vpop.f32.mrb[13].mxu1 }
 0x1d9   :  { %v446_v11 = vadd.f32 %v940_v59, %v445_v10  ;;  %1120 = vmatprep.mubr.msk.f32.mxu1 %vm480_vm6, %v466_v6 }
 0x1da   :  { %v469_v13 = vmax.f32 %v451_v9, 0.0  ;;  %1121 = vmatmul.mubr.msk.f32.gmra.mrb[18].mxu1 %vm480_vm6, %v467_v8 }
 0x1db   :  { %v468_v14 = vmax.f32 %v446_v11, 0.0  ;;  %v1110_v15 = vpop.f32.mrb[14].mxu1 }
 0x1dc   :  { %v461_v16 = vadd.f32 %v1110_v15, %v940_v59  ;;  %v455_v17 = vpop.f32.mrb[15].mxu1 }
 0x1dd   :  { %v456_v18 = vadd.f32 %v940_v59, %v455_v17  ;;  %1123 = vmatprep.mubr.msk.f32.mxu1 %vm480_vm6, %v468_v14 }
 0x1de   :  { %v471_v19 = vmax.f32 %v461_v16, 0.0  ;;  %1124 = vmatmul.mubr.msk.f32.gmra.mrb[20].mxu1 %vm480_vm6, %v469_v13 }
 0x1df   :  { %v470_v20 = vmax.f32 %v456_v18, 0.0 }
 0x1e1   :  { %1126 = vmatprep.mubr.msk.f32.mxu1 %vm480_vm6, %v470_v20 }
 0x1e2   :  { %1127 = vmatmul.mubr.msk.f32.gmra.mrb[22].mxu1 %vm480_vm6, %v471_v19 }
 0x2a9   :  { %v1119_v25 = vpop.f32.mrb[16].mxu1 }
 0x2aa   :  { %v577_v26 = vadd.f32 %v1119_v25, %v949_v24  ;;  %v571_v27 = vpop.f32.mrb[17].mxu1 }
 0x2ab   :  { %v572_v28 = vadd.f32 %v949_v24, %v571_v27 }
 0x2ac   :  { %v611_v29 = vmin.f32 %v577_v26, 0.0  ;;  %vm651_vm7 = vcmp.gt.f32.partialorder %v577_v26, 0.0 }
 0x2ad   :  { %v610_v30 = vmin.f32 %v572_v28, 0.0  ;;  %v1122_v31 = vpop.f32.mrb[18].mxu1  ;;  %vm650_vm8 = vcmp.gt.f32.partialorder %v572_v28, 0.0 }
 0x2ae   :  { %v620_v32 = vmul.f32 1.442695, %v611_v29  ;;  %v587_v33 = vadd.f32 %v1122_v31, %v949_v24  ;;  %v581_v34 = vpop.f32.mrb[19].mxu1 }
 0x2af   :  { %v618_v35 = vmul.f32 1.442695, %v610_v30  ;;  %v582_v36 = vadd.f32 %v949_v24, %v581_v34 }
 0x2b0   :  { %1205 = vpow2.f32 %v620_v32  ;;  %v613_v37 = vmin.f32 %v587_v33, 0.0  ;;  %vm653_vm9 = vcmp.gt.f32.partialorder %v587_v33, 0.0 }
 0x2b1   :  { %1207 = vpow2.f32 %v618_v35  ;;  %v612_v12 = vmin.f32 %v582_v36, 0.0  ;;  %v1125_v38 = vpop.f32.mrb[20].mxu1  ;;  %vm652_vm10 = vcmp.gt.f32.partialorder %v582_v36, 0.0 }
 0x2b2   :  { %v624_v39 = vmul.f32 1.442695, %v613_v37  ;;  %v597_v40 = vadd.f32 %v1125_v38, %v949_v24  ;;  %v591_v41 = vpop.f32.mrb[21].mxu1 }
 0x2b3   :  { %v622_v42 = vmul.f32 1.442695, %v612_v12  ;;  %v592_v43 = vadd.f32 %v949_v24, %v591_v41 }
 0x2b4   :  { %1209 = vpow2.f32 %v624_v39  ;;  %v615_v44 = vmin.f32 %v597_v40, 0.0  ;;  %vm655_vm11 = vcmp.gt.f32.partialorder %v597_v40, 0.0 }
 0x2b5   :  { %1211 = vpow2.f32 %v622_v42  ;;  %v614_v45 = vmin.f32 %v592_v43, 0.0  ;;  %v1128_v46 = vpop.f32.mrb[22].mxu1  ;;  %vm654_vm12 = vcmp.gt.f32.partialorder %v592_v43, 0.0 }
 0x2b6   :  { %v628_v47 = vmul.f32 1.442695, %v615_v44  ;;  %v607_v48 = vadd.f32 %v1128_v46, %v949_v24  ;;  %v601_v49 = vpop.f32.mrb[23].mxu1 }
 0x2b7   :  { %v626_v50 = vmul.f32 1.442695, %v614_v45  ;;  %v602_v51 = vadd.f32 %v949_v24, %v601_v49 }
 0x2b8   :  { %1213 = vpow2.f32 %v628_v47  ;;  %v617_v52 = vmin.f32 %v607_v48, 0.0  ;;  %vm657_vm13 = vcmp.gt.f32.partialorder %v607_v48, 0.0 }
 0x2b9   :  { %1215 = vpow2.f32 %v626_v50  ;;  %v616_v53 = vmin.f32 %v602_v51, 0.0  ;;  %vm656_vm14 = vcmp.gt.f32.partialorder %v602_v51, 0.0 }
 0x2ba   :  { %v1206_v54 = vpop.eup %1205  ;;  %v632_v55 = vmul.f32 1.442695, %v617_v52 }
 0x2bb   :  { %v1208_v56 = vpop.eup %1207  ;;  %v959_v57 = vadd.f32 -1.0, %v1206_v54  ;;  %v630_v58 = vmul.f32 1.442695, %v616_v53 }
 0x2bc   :  { %v958_v59 = vadd.f32 -1.0, %v1208_v56  ;;  %1217 = vpow2.f32 %v632_v55 }
 0x2bd   :  { %v643_v60 = vmul.f32 1.6732632, %v959_v57  ;;  %1219 = vpow2.f32 %v630_v58 }
 0x2be   :  { %v1210_v61 = vpop.eup %1209  ;;  %v642_v62 = vmul.f32 1.6732632, %v958_v59 }
 0x2bf   :  { %v1212_v63 = vpop.eup %1211  ;;  %v659_v0 = vsel %vm651_vm7, %v577_v26, %v643_v60  ;;  %v961_v1 = vadd.f32 -1.0, %v1210_v61 }
 0x2c0   :  { %v658_v2 = vsel %vm650_vm8, %v572_v28, %v642_v62  ;;  %v960_v3 = vadd.f32 -1.0, %v1212_v63  ;;  %v667_v7 = vmul.f32 1.050701, %v659_v0 }
 0x2c1   :  { %v666_v4 = vmul.f32 1.050701, %v658_v2  ;;  %v645_v5 = vmul.f32 1.6732632, %v961_v1 }
 0x2c2   :  { %v1214_v6 = vpop.eup %1213  ;;  %v644_v8 = vmul.f32 1.6732632, %v960_v3 }
 0x2c3   :  { %v1216_v9 = vpop.eup %1215  ;;  %v661_v10 = vsel %vm653_vm9, %v587_v33, %v645_v5  ;;  %v963_v11 = vadd.f32 -1.0, %v1214_v6  ;;  %1133 = vmatprep.mubr.msk.f32.mxu0 %vm56_vm0, %v666_v4  ;;  %v966_v33 = vld [vmem:[%s1558_s1 + $0x48] ss:$0 sm:$0xff] }
 0x2c4   :  { %v660_v13 = vsel %vm652_vm10, %v582_v36, %v644_v8  ;;  %v962_v14 = vadd.f32 -1.0, %v1216_v9  ;;  %1134 = vmatmul.mubr.msk.f32.vlgmr.msra.gmra.mrb[8].mxu0 %vm56_vm0, %v667_v7  ;;  %v669_v18 = vmul.f32 1.050701, %v661_v10 }
 0x2c5   :  { %v668_v15 = vmul.f32 1.050701, %v660_v13  ;;  %v647_v16 = vmul.f32 1.6732632, %v963_v11 }
 0x2c6   :  { %v1218_v17 = vpop.eup %1217  ;;  %v646_v19 = vmul.f32 1.6732632, %v962_v14 }
 0x2c7   :  { %v1220_v20 = vpop.eup %1219  ;;  %v663_v21 = vsel %vm655_vm11, %v597_v40, %v647_v16  ;;  %v965_v22 = vadd.f32 -1.0, %v1218_v17  ;;  %1136 = vmatprep.mubr.msk.f32.mxu0 %vm56_vm0, %v668_v15 }
 0x2c8   :  { %v662_v23 = vsel %vm654_vm12, %v592_v43, %v646_v19  ;;  %v964_v24 = vadd.f32 -1.0, %v1220_v20  ;;  %1137 = vmatmul.mubr.msk.f32.gmra.mrb[10].mxu0 %vm56_vm0, %v669_v18  ;;  %v671_v27 = vmul.f32 1.050701, %v663_v21 }
 0x2c9   :  { %v670_v25 = vmul.f32 1.050701, %v662_v23  ;;  %v649_v26 = vmul.f32 1.6732632, %v965_v22 }
 0x2ca   :  { %v648_v28 = vmul.f32 1.6732632, %v964_v24 }
 0x2cb   :  { %v665_v29 = vsel %vm657_vm13, %v607_v48, %v649_v26  ;;  %1139 = vmatprep.mubr.msk.f32.mxu0 %vm56_vm0, %v670_v25 }
 0x2cc   :  { %v664_v30 = vsel %vm656_vm14, %v602_v51, %v648_v28  ;;  %1140 = vmatmul.mubr.msk.f32.gmra.mrb[12].mxu0 %vm56_vm0, %v671_v27  ;;  %v673_v32 = vmul.f32 1.050701, %v665_v29 }
 0x2cd   :  { %v672_v31 = vmul.f32 1.050701, %v664_v30 }
 0x2cf   :  { %1142 = vmatprep.mubr.msk.f32.mxu1 %vm56_vm0, %v672_v31 }
 0x2d0   :  { %1143 = vmatmul.mubr.msk.f32.vlgmr.msra.gmra.mrb[24].mxu1 %vm56_vm0, %v673_v32 }
 0x397   :  { %v1135_v34 = vpop.f32.mrb[8].mxu0 }
 0x398   :  { %v780_v35 = vadd.f32 %v1135_v34, %v966_v33  ;;  %v774_v36 = vpop.f32.mrb[9].mxu0 }
 0x399   :  { %v775_v37 = vadd.f32 %v966_v33, %v774_v36 }
 0x39a   :  { %v817_v12 = vsel %vm813_vm15, %v780_v35, -inf }
 0x39b   :  { %818 = vmax.xlane.f32.xlu0 %v817_v12  ;;  %v1138_v38 = vpop.f32.mrb[10].mxu0  ;;  %v814_v43 = vsel %vm813_vm15, %v775_v37, -inf }
 0x39c   :  { %v790_v39 = vadd.f32 %v1138_v38, %v966_v33  ;;  %v784_v40 = vpop.f32.mrb[11].mxu0 }
 0x39d   :  { %v785_v41 = vadd.f32 %v966_v33, %v784_v40 }
 0x39e   :  { %v823_v42 = vsel %vm813_vm15, %v790_v39, -inf }
 0x39f   :  { %824 = vmax.xlane.f32.xlu1 %v823_v42  ;;  %v1141_v44 = vpop.f32.mrb[12].mxu0  ;;  %815 = vmax.xlane.f32.xlu0 %v814_v43  ;;  %v820_v48 = vsel %vm813_vm15, %v785_v41, -inf }
 0x3a0   :  { %v794_v45 = vpop.f32.mrb[13].mxu0  ;;  %v800_v47 = vadd.f32 %v1141_v44, %v966_v33 }
 0x3a1   :  { %v795_v46 = vadd.f32 %v966_v33, %v794_v45 }
 0x3a2   :  { %v829_v54 = vsel %vm813_vm15, %v800_v47, -inf }
 0x3a3   :  { %821 = vmax.xlane.f32.xlu1 %v820_v48  ;;  %v1144_v49 = vpop.f32.mrb[24].mxu1  ;;  %v826_v50 = vsel %vm813_vm15, %v795_v46, -inf }
 0x3a4   :  { %827 = vmax.xlane.f32.xlu0 %v826_v50  ;;  %v804_v51 = vpop.f32.mrb[25].mxu1  ;;  %v810_v53 = vadd.f32 %v1144_v49, %v966_v33 }
 0x3a5   :  { %v805_v52 = vadd.f32 %v966_v33, %v804_v51 }
 0x3a6   :  { %v835_v56 = vsel %vm813_vm15, %v810_v53, -inf }
 0x3a7   :  { %830 = vmax.xlane.f32.xlu1 %v829_v54  ;;  %v832_v55 = vsel %vm813_vm15, %v805_v52, -inf }
 0x3a8   :  { %833 = vmax.xlane.f32.xlu0 %v832_v55 }
 0x3ab   :  { %836 = vmax.xlane.f32.xlu1 %v835_v56 }
 0x428   :  { %v819_v57 = vpop.xlane.xlu0 %818 }
 0x429   :  { %v839_v58 = vsub.f32 %v780_v35, %v819_v57 }
 0x42b   :  { %v848_v59 = vmul.f32 1.442695, %v839_v58 }
 0x42c   :  { %v825_v60 = vpop.xlane.xlu1 %824  ;;  %v816_v61 = vpop.xlane.xlu0 %815 }
 0x42d   :  { %1221 = vpow2.f32 %v848_v59  ;;  %v841_v62 = vsub.f32 %v790_v39, %v825_v60  ;;  %v838_v63 = vsub.f32 %v775_v37, %v816_v61 }
 0x42f   :  { %v852_v0 = vmul.f32 1.442695, %v841_v62  ;;  %v846_v1 = vmul.f32 1.442695, %v838_v63 }
 0x430   :  { %v822_v2 = vpop.xlane.xlu1 %821 }
 0x431   :  { %1223 = vpow2.f32 %v852_v0  ;;  %v840_v3 = vsub.f32 %v785_v41, %v822_v2  ;;  %v828_v4 = vpop.xlane.xlu0 %827 }
 0x432   :  { %1225 = vpow2.f32 %v846_v1  ;;  %v842_v5 = vsub.f32 %v795_v46, %v828_v4 }
 0x433   :  { %v850_v6 = vmul.f32 1.442695, %v840_v3 }
 0x434   :  { %v854_v7 = vmul.f32 1.442695, %v842_v5  ;;  %v831_v8 = vpop.xlane.xlu1 %830 }
 0x435   :  { %1227 = vpow2.f32 %v850_v6  ;;  %v843_v9 = vsub.f32 %v800_v47, %v831_v8  ;;  %v834_v10 = vpop.xlane.xlu0 %833 }
 0x436   :  { %v844_v11 = vsub.f32 %v805_v52, %v834_v10  ;;  %1229 = vpow2.f32 %v854_v7 }
 0x437   :  { %v1222_v13 = vpop.eup %1221  ;;  %v856_v14 = vmul.f32 1.442695, %v843_v9 }
 0x438   :  { %v858_v15 = vmul.f32 1.442695, %v844_v11  ;;  %v837_v16 = vpop.xlane.xlu1 %836  ;;  %v865_v17 = vsel %vm813_vm15, %v1222_v13, 0.0 }
 0x439   :  { %1231 = vpow2.f32 %v856_v14  ;;  %v845_v18 = vsub.f32 %v810_v53, %v837_v16  ;;  %866 = vadd.xlane.f32.xlu1 %v865_v17 }
 0x43a   :  { %1233 = vpow2.f32 %v858_v15 }
 0x43b   :  { %v1224_v19 = vpop.eup %1223  ;;  %v860_v20 = vmul.f32 1.442695, %v845_v18 }
 0x43c   :  { %v1226_v21 = vpop.eup %1225  ;;  %v871_v22 = vsel %vm813_vm15, %v1224_v19, 0.0 }
 0x43d   :  { %1235 = vpow2.f32 %v860_v20  ;;  %872 = vadd.xlane.f32.xlu1 %v871_v22  ;;  %v862_v23 = vsel %vm813_vm15, %v1226_v21, 0.0 }
 0x43e   :  { %863 = vadd.xlane.f32.xlu0 %v862_v23 }
 0x43f   :  { %v1228_v24 = vpop.eup %1227 }
 0x440   :  { %v868_v25 = vsel %vm813_vm15, %v1228_v24, 0.0  ;;  %v1230_v26 = vpop.eup %1229 }
 0x441   :  { %v874_v29 = vsel %vm813_vm15, %v1230_v26, 0.0 }
 0x442   :  { %869 = vadd.xlane.f32.xlu0 %v868_v25 }
 0x443   :  { %v1232_v27 = vpop.eup %1231 }
 0x444   :  { %v877_v28 = vsel %vm813_vm15, %v1232_v27, 0.0  ;;  %v1234_v30 = vpop.eup %1233 }
 0x445   :  { %878 = vadd.xlane.f32.xlu1 %v877_v28  ;;  %v880_v33 = vsel %vm813_vm15, %v1234_v30, 0.0 }
 0x446   :  { %875 = vadd.xlane.f32.xlu0 %v874_v29 }
 0x447   :  { %v1236_v31 = vpop.eup %1235 }
 0x448   :  { %v883_v32 = vsel %vm813_vm15, %v1236_v31, 0.0 }
 0x449   :  { %884 = vadd.xlane.f32.xlu1 %v883_v32 }
 0x44a   :  { %881 = vadd.xlane.f32.xlu0 %v880_v33 }
 0x4c6   :  { %v867_v34 = vpop.xlane.xlu1 %866 }
 0x4c7   :  { %1237 = vrcp.f32 %v867_v34 }
 0x4ca   :  { %v873_v35 = vpop.xlane.xlu1 %872 }
 0x4cb   :  { %1239 = vrcp.f32 %v873_v35  ;;  %v864_v36 = vpop.xlane.xlu0 %863 }
 0x4cc   :  { %1241 = vrcp.f32 %v864_v36 }
 0x4cf   :  { %v870_v37 = vpop.xlane.xlu0 %869 }
 0x4d0   :  { %1243 = vrcp.f32 %v870_v37 }
 0x4d1   :  { %v1238_v12 = vpop.eup %1237 }
 0x4d2   :  { %v895_v38 = vmul.f32 %v1238_v12, %v1222_v13  ;;  %v879_v39 = vpop.xlane.xlu1 %878 }
 0x4d3   :  { %1245 = vrcp.f32 %v879_v39  ;;  %v876_v40 = vpop.xlane.xlu0 %875 }
 0x4d4   :  { %903 = vst.msk [vmem:[%s1559_s2 + $0x48] sm:$0xff] %vm813_vm15, %v895_v38  ;;  %1247 = vrcp.f32 %v876_v40 }
 0x4d5   :  { %v1240_v41 = vpop.eup %1239 }
 0x4d6   :  { %v1242_v42 = vpop.eup %1241  ;;  %v897_v43 = vmul.f32 %v1240_v41, %v1224_v19  ;;  %v885_v44 = vpop.xlane.xlu1 %884 }
 0x4d7   :  { %v894_v45 = vmul.f32 %v1242_v42, %v1226_v21  ;;  %1249 = vrcp.f32 %v885_v44  ;;  %v882_v46 = vpop.xlane.xlu0 %881 }
 0x4d8   :  { %905 = vst.msk [vmem:[%s1559_s2 + $0x58] sm:$0xff] %vm813_vm15, %v897_v43  ;;  %1251 = vrcp.f32 %v882_v46 }
 0x4d9   :  { %902 = vst.msk [vmem:[%s1559_s2 + $0x40] sm:$0xff] %vm813_vm15, %v894_v45 }
 0x4da   :  { %v1244_v47 = vpop.eup %1243 }
 0x4db   :  { %v896_v48 = vmul.f32 %v1244_v47, %v1228_v24 }
 0x4dd   :  { %v1246_v49 = vpop.eup %1245  ;;  %904 = vst.msk [vmem:[%s1559_s2 + $0x50] sm:$0xff] %vm813_vm15, %v896_v48 }
 0x4de   :  { %v1248_v50 = vpop.eup %1247  ;;  %v899_v51 = vmul.f32 %v1246_v49, %v1232_v27 }
 0x4df   :  { %v898_v52 = vmul.f32 %v1248_v50, %v1230_v26 }
 0x4e0   :  { %907 = vst.msk [vmem:[%s1559_s2 + $0x68] sm:$0xff] %vm813_vm15, %v899_v51 }
 0x4e1   :  { %v1250_v53 = vpop.eup %1249  ;;  %906 = vst.msk [vmem:[%s1559_s2 + $0x60] sm:$0xff] %vm813_vm15, %v898_v52 }
 0x4e2   :  { %v1252_v54 = vpop.eup %1251  ;;  %v901_v55 = vmul.f32 %v1250_v53, %v1236_v31 }
 0x4e3   :  { %v900_v56 = vmul.f32 %v1252_v54, %v1234_v30 }
 0x4e4   :  { %909 = vst.msk [vmem:[%s1559_s2 + $0x78] sm:$0xff] %vm813_vm15, %v901_v55 }
 0x4e5   :  { %908 = vst.msk [vmem:[%s1559_s2 + $0x70] sm:$0xff] %vm813_vm15, %v900_v56 }

</bundles_post_ra>
